<compile_context>
chip_gen: v7x
topology: tpu7x:2x2x1
jax: 0.10.0
libtpu: 0.0.40
codegen_flags: <defaults>
</compile_context>

<pallas_src>
import functools

import jax
import jax.numpy as jnp
from jax.experimental import pallas as pl
from jax.experimental.pallas import tpu as pltpu

EPS = 1e-5
CLASSES = 4
F_IN = 128          # per-branch feature width
F_CAT = 3 * F_IN    # 384
F_H1 = 128
F_H2 = 64
F_OUT_PAD = 128     # lane-dense padded logits width (sliced back to CLASSES)

MAX_TM = 512        # batch tile rows (>=512 ~ 85% HBM roofline; fits 64MiB VMEM)


def concat_fc_kernel(
    # activations (blocked over batch)
    spt_ref, scalo_ref, wave_ref,
    # per-branch BN as scale/shift (1, 128)
    spt_s, spt_t, sca_s, sca_t, wav_s, wav_t,
    # fc1 with bn1 folded in: three 128x128 slabs of W1^T + fused bias
    w1a, w1b, w1c, b1,
    # fc2 with bn2 folded in
    w2, b2,
    # fc3 padded to 128 output lanes
    w3, b3,
    # outputs
    logits_out, feat_out, spt_bn_out, sca_bn_out, wav_bn_out,
):
    # input BatchNorms: single fused multiply-add per branch
    spt_bn = spt_ref[...] * spt_s[...] + spt_t[...]
    sca_bn = scalo_ref[...] * sca_s[...] + sca_t[...]
    wav_bn = wave_ref[...] * wav_s[...] + wav_t[...]

    spt_bn_out[...] = spt_bn
    sca_bn_out[...] = sca_bn
    wav_bn_out[...] = wav_bn

    # fc1(concat([spt, sca, wav], 1)) + bn1, expressed as a sum of three
    # 128-wide contractions (exact) with bn1 folded into the weights/bias.
    h1 = (jnp.dot(spt_bn, w1a[...], preferred_element_type=jnp.float32)
          + jnp.dot(sca_bn, w1b[...], preferred_element_type=jnp.float32)
          + jnp.dot(wav_bn, w1c[...], preferred_element_type=jnp.float32)
          + b1[...])
    feat_out[...] = h1                               # concat_feature (post-bn1)

    # fc2 + bn2 (folded)
    h2 = jnp.dot(h1, w2[...], preferred_element_type=jnp.float32) + b2[...]

    # fc3, padded to a lane-dense 128-wide store
    logits_out[...] = (jnp.dot(h2, w3[...], preferred_element_type=jnp.float32)
                       + b3[...])


def init_params(key):
    """Deterministic synthetic parameters with the same shapes as the module."""
    ks = jax.random.split(key, 16)
    p = {}
    # Linear layers (PyTorch shape: weight (out, in), bias (out,))
    p["fc1_w"] = jax.random.normal(ks[0], (F_H1, F_CAT), jnp.float32) * 0.05
    p["fc1_b"] = jax.random.normal(ks[1], (F_H1,), jnp.float32) * 0.05
    p["fc2_w"] = jax.random.normal(ks[2], (F_H2, F_H1), jnp.float32) * 0.05
    p["fc2_b"] = jax.random.normal(ks[3], (F_H2,), jnp.float32) * 0.05
    p["fc3_w"] = jax.random.normal(ks[4], (CLASSES, F_H2), jnp.float32) * 0.05
    p["fc3_b"] = jax.random.normal(ks[5], (CLASSES,), jnp.float32) * 0.05

    def bn(kg, kb, km, kv, n):
        return dict(
            gamma=1.0 + 0.1 * jax.random.normal(kg, (n,), jnp.float32),
            beta=0.1 * jax.random.normal(kb, (n,), jnp.float32),
            mean=0.1 * jax.random.normal(km, (n,), jnp.float32),
            var=1.0 + 0.1 * jax.random.uniform(kv, (n,), jnp.float32),
        )

    bk = jax.random.split(ks[6], 20)
    p["bn_spt"] = bn(bk[0], bk[1], bk[2], bk[3], F_IN)
    p["bn_sca"] = bn(bk[4], bk[5], bk[6], bk[7], F_IN)
    p["bn_wav"] = bn(bk[8], bk[9], bk[10], bk[11], F_IN)
    p["bn1"] = bn(bk[12], bk[13], bk[14], bk[15], F_H1)
    p["bn2"] = bn(bk[16], bk[17], bk[18], bk[19], F_H2)
    return p


def _bn_scale_shift(q):
    scale = q["gamma"] * jax.lax.rsqrt(q["var"] + EPS)
    shift = q["beta"] - q["mean"] * scale
    return scale.reshape(1, -1), shift.reshape(1, -1)


@functools.partial(jax.jit, static_argnames=("block_rows",))
def concat_fc_forward(spt, scalo, wave, p, *, block_rows=MAX_TM):
    B = spt.shape[0]

    # ---- batch tiling (pad B to a multiple of the row tile) ----------------
    tm = min(block_rows, max(8, -(-B // 8) * 8))      # >= 8, <= block_rows
    b_pad = -(-B // tm) * tm
    if b_pad != B:
        pad = ((0, b_pad - B), (0, 0))
        spt_p = jnp.pad(spt, pad)
        scalo_p = jnp.pad(scalo, pad)
        wave_p = jnp.pad(wave, pad)
    else:
        spt_p, scalo_p, wave_p = spt, scalo, wave
    n_blocks = b_pad // tm

    # ---- parameter prep (glue, not hot path) -------------------------------
    # input BNs -> scale/shift
    spt_s, spt_t = _bn_scale_shift(p["bn_spt"])
    sca_s, sca_t = _bn_scale_shift(p["bn_sca"])
    wav_s, wav_t = _bn_scale_shift(p["bn_wav"])

    # fold bn1 into fc1: scale output columns of W1^T, fold mean/beta into bias
    s1 = p["bn1"]["gamma"] * jax.lax.rsqrt(p["bn1"]["var"] + EPS)   # (128,)
    w1t = p["fc1_w"].T * s1[None, :]                                # (384, 128)
    b1 = ((p["fc1_b"] - p["bn1"]["mean"]) * s1 + p["bn1"]["beta"]).reshape(1, -1)
    w1a, w1b, w1c = w1t[:F_IN], w1t[F_IN:2 * F_IN], w1t[2 * F_IN:]

    # fold bn2 into fc2
    s2 = p["bn2"]["gamma"] * jax.lax.rsqrt(p["bn2"]["var"] + EPS)   # (64,)
    w2t = p["fc2_w"].T * s2[None, :]                                # (128, 64)
    b2 = ((p["fc2_b"] - p["bn2"]["mean"]) * s2 + p["bn2"]["beta"]).reshape(1, -1)

    # fc3 padded to 128 output lanes (lane-dense stores)
    w3t = jnp.zeros((F_H2, F_OUT_PAD), jnp.float32).at[:, :CLASSES].set(p["fc3_w"].T)
    b3 = jnp.zeros((1, F_OUT_PAD), jnp.float32).at[:, :CLASSES].set(p["fc3_b"])

    args = (
        spt_p, scalo_p, wave_p,
        spt_s, spt_t, sca_s, sca_t, wav_s, wav_t,
        w1a, w1b, w1c, b1,
        w2t, b2,
        w3t, b3,
    )

    # ---- BlockSpecs ---------------------------------------------------------
    def act_spec(f):
        return pl.BlockSpec((tm, f), lambda i: (i, 0))

    def param_spec(shape):
        return pl.BlockSpec(shape, lambda i: (0, 0))

    in_specs = [
        act_spec(F_IN), act_spec(F_IN), act_spec(F_IN),          # activations
        param_spec((1, F_IN)), param_spec((1, F_IN)),            # spt scale/shift
        param_spec((1, F_IN)), param_spec((1, F_IN)),            # sca scale/shift
        param_spec((1, F_IN)), param_spec((1, F_IN)),            # wav scale/shift
        param_spec((F_IN, F_H1)), param_spec((F_IN, F_H1)),      # w1a, w1b
        param_spec((F_IN, F_H1)), param_spec((1, F_H1)),         # w1c, b1
        param_spec((F_H1, F_H2)), param_spec((1, F_H2)),         # w2, b2
        param_spec((F_H2, F_OUT_PAD)), param_spec((1, F_OUT_PAD)),  # w3, b3
    ]
    out_specs = (
        act_spec(F_OUT_PAD),   # padded logits
        act_spec(F_H1),        # concat_feature
        act_spec(F_IN),        # spt_bn
        act_spec(F_IN),        # scalo_bn
        act_spec(F_IN),        # wave_bn
    )
    out_shape = (
        jax.ShapeDtypeStruct((b_pad, F_OUT_PAD), jnp.float32),
        jax.ShapeDtypeStruct((b_pad, F_H1), jnp.float32),
        jax.ShapeDtypeStruct((b_pad, F_IN), jnp.float32),
        jax.ShapeDtypeStruct((b_pad, F_IN), jnp.float32),
        jax.ShapeDtypeStruct((b_pad, F_IN), jnp.float32),
    )

    # VMEM budget: 8 activation tiles (3 in + 5 out) of width <=128, f32,
    # double-buffered, plus ~0.3 MiB of resident params.  Keep headroom.
    tile_bytes = 8 * tm * 128 * 4 * 2
    vmem_limit = min(64 * 1024 * 1024, max(16 * 1024 * 1024, 2 * tile_bytes))

    flops = 2 * b_pad * (F_CAT * F_H1 + F_H1 * F_H2 + F_H2 * F_OUT_PAD)
    bytes_accessed = 4 * (b_pad * (3 * F_IN + F_OUT_PAD + F_H1 + 3 * F_IN)
                          + F_CAT * F_H1 + F_H1 * F_H2 + F_H2 * F_OUT_PAD)

    out = pl.pallas_call(
        concat_fc_kernel,
        grid=(n_blocks,),
        in_specs=in_specs,
        out_specs=out_specs,
        out_shape=out_shape,
        compiler_params=pltpu.CompilerParams(
            dimension_semantics=("parallel",),
            vmem_limit_bytes=vmem_limit,
        ),
        cost_estimate=pl.CostEstimate(
            flops=flops, transcendentals=0, bytes_accessed=bytes_accessed),
    )(*args)

    logits_p, feat_p, spt_bn_p, sca_bn_p, wav_bn_p = out
    logits = logits_p[:B, :CLASSES]
    feat = feat_p[:B]
    spt_bn = spt_bn_p[:B]
    sca_bn = sca_bn_p[:B]
    wav_bn = wav_bn_p[:B]

    # module also returns the raw inputs untouched
    return logits, feat, spt_bn, sca_bn, wav_bn, spt, scalo, wave


def _reference(spt, scalo, wave, p):
    """Pure-JAX reference matching the PyTorch eval-mode forward."""
    def bn(x, q):
        return (x - q["mean"]) * (q["gamma"] / jnp.sqrt(q["var"] + EPS)) + q["beta"]
    s = bn(spt, p["bn_spt"]); c = bn(scalo, p["bn_sca"]); w = bn(wave, p["bn_wav"])
    x = jnp.concatenate([s, c, w], axis=1)
    x = x @ p["fc1_w"].T + p["fc1_b"]
    x = bn(x, p["bn1"])
    feat = x
    x = x @ p["fc2_w"].T + p["fc2_b"]
    x = bn(x, p["bn2"])
    x = x @ p["fc3_w"].T + p["fc3_b"]
    return x, feat, s, c, w


if __name__ == "__main__":
    B = 8
    key = jax.random.PRNGKey(0)
    k1, k2, k3 = jax.random.split(key, 3)
    spt = jax.random.normal(k1, (B, F_IN), jnp.float32)
    scalo = jax.random.normal(k2, (B, F_IN), jnp.float32)
    wave = jax.random.normal(k3, (B, F_IN), jnp.float32)

    params = init_params(jax.random.PRNGKey(42))

    outs = concat_fc_forward(spt, scalo, wave, params)
    outs = jax.block_until_ready(outs)

    refs = _reference(spt, scalo, wave, params)
    for got, ref in zip(outs[:5], refs):
        assert got.shape == ref.shape, f"shape mismatch {got.shape} vs {ref.shape}"
        assert jnp.allclose(got, ref, atol=1e-4, rtol=1e-4), "mismatch vs reference"

    print("KERNEL_OK")
</pallas_src>

<mosaic_0001>
module attributes {stable_mosaic.version = 11 : i64} {
  func.func @concat_fc_kernel(%arg0: i32, %arg1: memref<8x128xf32, #tpu.memory_space<vmem>>, %arg2: memref<8x128xf32, #tpu.memory_space<vmem>>, %arg3: memref<8x128xf32, #tpu.memory_space<vmem>>, %arg4: memref<1x128xf32, #tpu.memory_space<vmem>>, %arg5: memref<1x128xf32, #tpu.memory_space<vmem>>, %arg6: memref<1x128xf32, #tpu.memory_space<vmem>>, %arg7: memref<1x128xf32, #tpu.memory_space<vmem>>, %arg8: memref<1x128xf32, #tpu.memory_space<vmem>>, %arg9: memref<1x128xf32, #tpu.memory_space<vmem>>, %arg10: memref<128x128xf32, #tpu.memory_space<vmem>>, %arg11: memref<128x128xf32, #tpu.memory_space<vmem>>, %arg12: memref<128x128xf32, #tpu.memory_space<vmem>>, %arg13: memref<1x128xf32, #tpu.memory_space<vmem>>, %arg14: memref<128x64xf32, #tpu.memory_space<vmem>>, %arg15: memref<1x64xf32, #tpu.memory_space<vmem>>, %arg16: memref<64x128xf32, #tpu.memory_space<vmem>>, %arg17: memref<1x128xf32, #tpu.memory_space<vmem>>, %arg18: memref<8x128xf32, #tpu.memory_space<vmem>>, %arg19: memref<8x128xf32, #tpu.memory_space<vmem>>, %arg20: memref<8x128xf32, #tpu.memory_space<vmem>>, %arg21: memref<8x128xf32, #tpu.memory_space<vmem>>, %arg22: memref<8x128xf32, #tpu.memory_space<vmem>>) attributes {dimension_semantics = [#tpu.dimension_semantics<parallel>], iteration_bounds = array<i64: 1>, scalar_prefetch = 0 : i64, scratch_operands = 0 : i64, tpu.core_type = #tpu.core_type<tc>, window_params = [{transform_indices = @transform_0, window_bounds = array<i64: 8, 128>}, {transform_indices = @transform_1, window_bounds = array<i64: 8, 128>}, {transform_indices = @transform_2, window_bounds = array<i64: 8, 128>}, {pipeline_mode = #tpu.pipeline_mode<synchronous>, transform_indices = @transform_3, window_bounds = array<i64: 1, 128>}, {pipeline_mode = #tpu.pipeline_mode<synchronous>, transform_indices = @transform_4, window_bounds = array<i64: 1, 128>}, {pipeline_mode = #tpu.pipeline_mode<synchronous>, transform_indices = @transform_5, window_bounds = array<i64: 1, 128>}, {pipeline_mode = #tpu.pipeline_mode<synchronous>, transform_indices = @transform_6, window_bounds = array<i64: 1, 128>}, {pipeline_mode = #tpu.pipeline_mode<synchronous>, transform_indices = @transform_7, window_bounds = array<i64: 1, 128>}, {pipeline_mode = #tpu.pipeline_mode<synchronous>, transform_indices = @transform_8, window_bounds = array<i64: 1, 128>}, {pipeline_mode = #tpu.pipeline_mode<synchronous>, transform_indices = @transform_9, window_bounds = array<i64: 128, 128>}, {pipeline_mode = #tpu.pipeline_mode<synchronous>, transform_indices = @transform_10, window_bounds = array<i64: 128, 128>}, {pipeline_mode = #tpu.pipeline_mode<synchronous>, transform_indices = @transform_11, window_bounds = array<i64: 128, 128>}, {pipeline_mode = #tpu.pipeline_mode<synchronous>, transform_indices = @transform_12, window_bounds = array<i64: 1, 128>}, {pipeline_mode = #tpu.pipeline_mode<synchronous>, transform_indices = @transform_13, window_bounds = array<i64: 128, 64>}, {pipeline_mode = #tpu.pipeline_mode<synchronous>, transform_indices = @transform_14, window_bounds = array<i64: 1, 64>}, {pipeline_mode = #tpu.pipeline_mode<synchronous>, transform_indices = @transform_15, window_bounds = array<i64: 64, 128>}, {pipeline_mode = #tpu.pipeline_mode<synchronous>, transform_indices = @transform_16, window_bounds = array<i64: 1, 128>}, {transform_indices = @transform_17, window_bounds = array<i64: 8, 128>}, {transform_indices = @transform_18, window_bounds = array<i64: 8, 128>}, {transform_indices = @transform_19, window_bounds = array<i64: 8, 128>}, {transform_indices = @transform_20, window_bounds = array<i64: 8, 128>}, {transform_indices = @transform_21, window_bounds = array<i64: 8, 128>}]} {
    %c0 = arith.constant 0 : index
    %c0_0 = arith.constant 0 : index
    %0 = vector.load %arg1[%c0, %c0_0] : memref<8x128xf32, #tpu.memory_space<vmem>>, vector<8x128xf32>
    %c0_1 = arith.constant 0 : index
    %c0_2 = arith.constant 0 : index
    %1 = vector.load %arg4[%c0_1, %c0_2] : memref<1x128xf32, #tpu.memory_space<vmem>>, vector<1x128xf32>
    %2 = vector.broadcast %1 : vector<1x128xf32> to vector<8x128xf32>
    %3 = arith.mulf %0, %2 : vector<8x128xf32>
    %c0_3 = arith.constant 0 : index
    %c0_4 = arith.constant 0 : index
    %4 = vector.load %arg5[%c0_3, %c0_4] : memref<1x128xf32, #tpu.memory_space<vmem>>, vector<1x128xf32>
    %5 = vector.broadcast %4 : vector<1x128xf32> to vector<8x128xf32>
    %6 = arith.addf %3, %5 : vector<8x128xf32>
    %c0_5 = arith.constant 0 : index
    %c0_6 = arith.constant 0 : index
    %7 = vector.load %arg2[%c0_5, %c0_6] : memref<8x128xf32, #tpu.memory_space<vmem>>, vector<8x128xf32>
    %c0_7 = arith.constant 0 : index
    %c0_8 = arith.constant 0 : index
    %8 = vector.load %arg6[%c0_7, %c0_8] : memref<1x128xf32, #tpu.memory_space<vmem>>, vector<1x128xf32>
    %9 = vector.broadcast %8 : vector<1x128xf32> to vector<8x128xf32>
    %10 = arith.mulf %7, %9 : vector<8x128xf32>
    %c0_9 = arith.constant 0 : index
    %c0_10 = arith.constant 0 : index
    %11 = vector.load %arg7[%c0_9, %c0_10] : memref<1x128xf32, #tpu.memory_space<vmem>>, vector<1x128xf32>
    %12 = vector.broadcast %11 : vector<1x128xf32> to vector<8x128xf32>
    %13 = arith.addf %10, %12 : vector<8x128xf32>
    %c0_11 = arith.constant 0 : index
    %c0_12 = arith.constant 0 : index
    %14 = vector.load %arg3[%c0_11, %c0_12] : memref<8x128xf32, #tpu.memory_space<vmem>>, vector<8x128xf32>
    %c0_13 = arith.constant 0 : index
    %c0_14 = arith.constant 0 : index
    %15 = vector.load %arg8[%c0_13, %c0_14] : memref<1x128xf32, #tpu.memory_space<vmem>>, vector<1x128xf32>
    %16 = vector.broadcast %15 : vector<1x128xf32> to vector<8x128xf32>
    %17 = arith.mulf %14, %16 : vector<8x128xf32>
    %c0_15 = arith.constant 0 : index
    %c0_16 = arith.constant 0 : index
    %18 = vector.load %arg9[%c0_15, %c0_16] : memref<1x128xf32, #tpu.memory_space<vmem>>, vector<1x128xf32>
    %19 = vector.broadcast %18 : vector<1x128xf32> to vector<8x128xf32>
    %20 = arith.addf %17, %19 : vector<8x128xf32>
    %c0_17 = arith.constant 0 : index
    %c0_18 = arith.constant 0 : index
    %21 = vector.load %arg20[%c0_17, %c0_18] : memref<8x128xf32, #tpu.memory_space<vmem>>, vector<8x128xf32>
    tpu.vector_store %arg20[%c0_17, %c0_18], %6 {strides = array<i32>} : memref<8x128xf32, #tpu.memory_space<vmem>>, vector<8x128xf32>,
    %c0_19 = arith.constant 0 : index
    %c0_20 = arith.constant 0 : index
    %22 = vector.load %arg21[%c0_19, %c0_20] : memref<8x128xf32, #tpu.memory_space<vmem>>, vector<8x128xf32>
    tpu.vector_store %arg21[%c0_19, %c0_20], %13 {strides = array<i32>} : memref<8x128xf32, #tpu.memory_space<vmem>>, vector<8x128xf32>,
    %c0_21 = arith.constant 0 : index
    %c0_22 = arith.constant 0 : index
    %23 = vector.load %arg22[%c0_21, %c0_22] : memref<8x128xf32, #tpu.memory_space<vmem>>, vector<8x128xf32>
    tpu.vector_store %arg22[%c0_21, %c0_22], %20 {strides = array<i32>} : memref<8x128xf32, #tpu.memory_space<vmem>>, vector<8x128xf32>,
    %c0_23 = arith.constant 0 : index
    %c0_24 = arith.constant 0 : index
    %24 = vector.load %arg10[%c0_23, %c0_24] : memref<128x128xf32, #tpu.memory_space<vmem>>, vector<128x128xf32>
    %cst = arith.constant dense<0.000000e+00> : vector<8x128xf32>
    %25 = tpu.matmul %6, %24, %cst {dimension_numbers = #tpu.dot_dimension_numbers<[1], [0], [0], [1], [0, 0, 1, 1], [], []>} : vector<8x128xf32>, vector<128x128xf32>, vector<8x128xf32> -> vector<8x128xf32>
    %c0_25 = arith.constant 0 : index
    %c0_26 = arith.constant 0 : index
    %26 = vector.load %arg11[%c0_25, %c0_26] : memref<128x128xf32, #tpu.memory_space<vmem>>, vector<128x128xf32>
    %cst_27 = arith.constant dense<0.000000e+00> : vector<8x128xf32>
    %27 = tpu.matmul %13, %26, %cst_27 {dimension_numbers = #tpu.dot_dimension_numbers<[1], [0], [0], [1], [0, 0, 1, 1], [], []>} : vector<8x128xf32>, vector<128x128xf32>, vector<8x128xf32> -> vector<8x128xf32>
    %28 = arith.addf %25, %27 : vector<8x128xf32>
    %c0_28 = arith.constant 0 : index
    %c0_29 = arith.constant 0 : index
    %29 = vector.load %arg12[%c0_28, %c0_29] : memref<128x128xf32, #tpu.memory_space<vmem>>, vector<128x128xf32>
    %cst_30 = arith.constant dense<0.000000e+00> : vector<8x128xf32>
    %30 = tpu.matmul %20, %29, %cst_30 {dimension_numbers = #tpu.dot_dimension_numbers<[1], [0], [0], [1], [0, 0, 1, 1], [], []>} : vector<8x128xf32>, vector<128x128xf32>, vector<8x128xf32> -> vector<8x128xf32>
    %31 = arith.addf %28, %30 : vector<8x128xf32>
    %c0_31 = arith.constant 0 : index
    %c0_32 = arith.constant 0 : index
    %32 = vector.load %arg13[%c0_31, %c0_32] : memref<1x128xf32, #tpu.memory_space<vmem>>, vector<1x128xf32>
    %33 = vector.broadcast %32 : vector<1x128xf32> to vector<8x128xf32>
    %34 = arith.addf %31, %33 : vector<8x128xf32>
    %c0_33 = arith.constant 0 : index
    %c0_34 = arith.constant 0 : index
    %35 = vector.load %arg19[%c0_33, %c0_34] : memref<8x128xf32, #tpu.memory_space<vmem>>, vector<8x128xf32>
    tpu.vector_store %arg19[%c0_33, %c0_34], %34 {strides = array<i32>} : memref<8x128xf32, #tpu.memory_space<vmem>>, vector<8x128xf32>,
    %c0_35 = arith.constant 0 : index
    %c0_36 = arith.constant 0 : index
    %36 = vector.load %arg14[%c0_35, %c0_36] : memref<128x64xf32, #tpu.memory_space<vmem>>, vector<128x64xf32>
    %cst_37 = arith.constant dense<0.000000e+00> : vector<8x64xf32>
    %37 = tpu.matmul %34, %36, %cst_37 {dimension_numbers = #tpu.dot_dimension_numbers<[1], [0], [0], [1], [0, 0, 1, 1], [], []>} : vector<8x128xf32>, vector<128x64xf32>, vector<8x64xf32> -> vector<8x64xf32>
    %c0_38 = arith.constant 0 : index
    %c0_39 = arith.constant 0 : index
    %38 = vector.load %arg15[%c0_38, %c0_39] : memref<1x64xf32, #tpu.memory_space<vmem>>, vector<1x64xf32>
    %39 = vector.broadcast %38 : vector<1x64xf32> to vector<8x64xf32>
    %40 = arith.addf %37, %39 : vector<8x64xf32>
    %c0_40 = arith.constant 0 : index
    %c0_41 = arith.constant 0 : index
    %41 = vector.load %arg16[%c0_40, %c0_41] : memref<64x128xf32, #tpu.memory_space<vmem>>, vector<64x128xf32>
    %cst_42 = arith.constant dense<0.000000e+00> : vector<8x128xf32>
    %42 = tpu.matmul %40, %41, %cst_42 {dimension_numbers = #tpu.dot_dimension_numbers<[1], [0], [0], [1], [0, 0, 1, 1], [], []>} : vector<8x64xf32>, vector<64x128xf32>, vector<8x128xf32> -> vector<8x128xf32>
    %c0_43 = arith.constant 0 : index
    %c0_44 = arith.constant 0 : index
    %43 = vector.load %arg17[%c0_43, %c0_44] : memref<1x128xf32, #tpu.memory_space<vmem>>, vector<1x128xf32>
    %44 = vector.broadcast %43 : vector<1x128xf32> to vector<8x128xf32>
    %45 = arith.addf %42, %44 : vector<8x128xf32>
    %c0_45 = arith.constant 0 : index
    %c0_46 = arith.constant 0 : index
    %46 = vector.load %arg18[%c0_45, %c0_46] : memref<8x128xf32, #tpu.memory_space<vmem>>, vector<8x128xf32>
    tpu.vector_store %arg18[%c0_45, %c0_46], %45 {strides = array<i32>} : memref<8x128xf32, #tpu.memory_space<vmem>>, vector<8x128xf32>,
    return
  }
  func.func @transform_0(%arg0: i32) -> (i32, i32) {
    %c0_i32 = arith.constant 0 : i32
    %c0_i32_0 = arith.constant 0 : i32
    return %arg0, %c0_i32 : i32, i32
  }
  func.func @transform_1(%arg0: i32) -> (i32, i32) {
    %c0_i32 = arith.constant 0 : i32
    %c0_i32_0 = arith.constant 0 : i32
    return %arg0, %c0_i32 : i32, i32
  }
  func.func @transform_2(%arg0: i32) -> (i32, i32) {
    %c0_i32 = arith.constant 0 : i32
    %c0_i32_0 = arith.constant 0 : i32
    return %arg0, %c0_i32 : i32, i32
  }
  func.func @transform_3(%arg0: i32) -> (i32, i32) {
    %c0_i32 = arith.constant 0 : i32
    %c0_i32_0 = arith.constant 0 : i32
    %c0_i32_1 = arith.constant 0 : i32
    return %c0_i32, %c0_i32_0 : i32, i32
  }
  func.func @transform_4(%arg0: i32) -> (i32, i32) {
    %c0_i32 = arith.constant 0 : i32
    %c0_i32_0 = arith.constant 0 : i32
    %c0_i32_1 = arith.constant 0 : i32
    return %c0_i32, %c0_i32_0 : i32, i32
  }
  func.func @transform_5(%arg0: i32) -> (i32, i32) {
    %c0_i32 = arith.constant 0 : i32
    %c0_i32_0 = arith.constant 0 : i32
    %c0_i32_1 = arith.constant 0 : i32
    return %c0_i32, %c0_i32_0 : i32, i32
  }
  func.func @transform_6(%arg0: i32) -> (i32, i32) {
    %c0_i32 = arith.constant 0 : i32
    %c0_i32_0 = arith.constant 0 : i32
    %c0_i32_1 = arith.constant 0 : i32
    return %c0_i32, %c0_i32_0 : i32, i32
  }
  func.func @transform_7(%arg0: i32) -> (i32, i32) {
    %c0_i32 = arith.constant 0 : i32
    %c0_i32_0 = arith.constant 0 : i32
    %c0_i32_1 = arith.constant 0 : i32
    return %c0_i32, %c0_i32_0 : i32, i32
  }
  func.func @transform_8(%arg0: i32) -> (i32, i32) {
    %c0_i32 = arith.constant 0 : i32
    %c0_i32_0 = arith.constant 0 : i32
    %c0_i32_1 = arith.constant 0 : i32
    return %c0_i32, %c0_i32_0 : i32, i32
  }
  func.func @transform_9(%arg0: i32) -> (i32, i32) {
    %c0_i32 = arith.constant 0 : i32
    %c0_i32_0 = arith.constant 0 : i32
    %c0_i32_1 = arith.constant 0 : i32
    return %c0_i32, %c0_i32_0 : i32, i32
  }
  func.func @transform_10(%arg0: i32) -> (i32, i32) {
    %c0_i32 = arith.constant 0 : i32
    %c0_i32_0 = arith.constant 0 : i32
    %c0_i32_1 = arith.constant 0 : i32
    return %c0_i32, %c0_i32_0 : i32, i32
  }
  func.func @transform_11(%arg0: i32) -> (i32, i32) {
    %c0_i32 = arith.constant 0 : i32
    %c0_i32_0 = arith.constant 0 : i32
    %c0_i32_1 = arith.constant 0 : i32
    return %c0_i32, %c0_i32_0 : i32, i32
  }
  func.func @transform_12(%arg0: i32) -> (i32, i32) {
    %c0_i32 = arith.constant 0 : i32
    %c0_i32_0 = arith.constant 0 : i32
    %c0_i32_1 = arith.constant 0 : i32
    return %c0_i32, %c0_i32_0 : i32, i32
  }
  func.func @transform_13(%arg0: i32) -> (i32, i32) {
    %c0_i32 = arith.constant 0 : i32
    %c0_i32_0 = arith.constant 0 : i32
    %c0_i32_1 = arith.constant 0 : i32
    return %c0_i32, %c0_i32_0 : i32, i32
  }
  func.func @transform_14(%arg0: i32) -> (i32, i32) {
    %c0_i32 = arith.constant 0 : i32
    %c0_i32_0 = arith.constant 0 : i32
    %c0_i32_1 = arith.constant 0 : i32
    return %c0_i32, %c0_i32_0 : i32, i32
  }
  func.func @transform_15(%arg0: i32) -> (i32, i32) {
    %c0_i32 = arith.constant 0 : i32
    %c0_i32_0 = arith.constant 0 : i32
    %c0_i32_1 = arith.constant 0 : i32
    return %c0_i32, %c0_i32_0 : i32, i32
  }
  func.func @transform_16(%arg0: i32) -> (i32, i32) {
    %c0_i32 = arith.constant 0 : i32
    %c0_i32_0 = arith.constant 0 : i32
    %c0_i32_1 = arith.constant 0 : i32
    return %c0_i32, %c0_i32_0 : i32, i32
  }
  func.func @transform_17(%arg0: i32) -> (i32, i32) {
    %c0_i32 = arith.constant 0 : i32
    %c0_i32_0 = arith.constant 0 : i32
    return %arg0, %c0_i32 : i32, i32
  }
  func.func @transform_18(%arg0: i32) -> (i32, i32) {
    %c0_i32 = arith.constant 0 : i32
    %c0_i32_0 = arith.constant 0 : i32
    return %arg0, %c0_i32 : i32, i32
  }
  func.func @transform_19(%arg0: i32) -> (i32, i32) {
    %c0_i32 = arith.constant 0 : i32
    %c0_i32_0 = arith.constant 0 : i32
    return %arg0, %c0_i32 : i32, i32
  }
  func.func @transform_20(%arg0: i32) -> (i32, i32) {
    %c0_i32 = arith.constant 0 : i32
    %c0_i32_0 = arith.constant 0 : i32
    return %arg0, %c0_i32 : i32, i32
  }
  func.func @transform_21(%arg0: i32) -> (i32, i32) {
    %c0_i32 = arith.constant 0 : i32
    %c0_i32_0 = arith.constant 0 : i32
    return %arg0, %c0_i32 : i32, i32
  }
}

</mosaic_0001>

<bundles_post_ra>
// kernel: concat_fc_forward.1
= control target key start
LH: loop header
LB: loop body
LE: loop exit
PB: predicated region body
PF: predicated region fallthrough
CT: control target
= control target key end

     0   :  { %s1553_s0 = inlined_call_operand.vmem [shape: f32[8,128], index: 0, kind: input, shape index: {}]   ;;  %s1554_s1 = inlined_call_operand.vmem [shape: f32[8,128], index: 1, kind: input, shape index: {}]   ;;  %s1555_s2 = inlined_call_operand.vmem [shape: f32[8,128], index: 2, kind: input, shape index: {}]   ;;  %s1556_s3 = inlined_call_operand.vmem [shape: f32[1,128], index: 3, kind: input, shape index: {}]   ;;  %s1557_s4 = inlined_call_operand.vmem [shape: f32[1,128], index: 4, kind: input, shape index: {}]   ;;  %s1558_s5 = inlined_call_operand.vmem [shape: f32[1,128], index: 5, kind: input, shape index: {}]   ;;  %s1559_s6 = inlined_call_operand.vmem [shape: f32[1,128], index: 6, kind: input, shape index: {}]   ;;  %s1560_s7 = inlined_call_operand.vmem [shape: f32[1,128], index: 7, kind: input, shape index: {}]   ;;  %s1561_s8 = inlined_call_operand.vmem [shape: f32[1,128], index: 8, kind: input, shape index: {}]   ;;  %s1562_s9 = inlined_call_operand.vmem [shape: f32[128,128], index: 9, kind: input, shape index: {}]   ;;  %s1563_s10 = inlined_call_operand.vmem [shape: f32[128,128], index: 10, kind: input, shape index: {}]   ;;  %s1564_s11 = inlined_call_operand.vmem [shape: f32[128,128], index: 11, kind: input, shape index: {}]   ;;  %s1565_s12 = inlined_call_operand.vmem [shape: f32[1,128], index: 12, kind: input, shape index: {}]   ;;  %s1566_s13 = inlined_call_operand.vmem [shape: f32[128,64], index: 13, kind: input, shape index: {}]   ;;  %s1567_s14 = inlined_call_operand.vmem [shape: f32[1,64], index: 14, kind: input, shape index: {}]   ;;  %s1568_s15 = inlined_call_operand.vmem [shape: f32[64,128], index: 15, kind: input, shape index: {}]   ;;  %s1569_s16 = inlined_call_operand.vmem [shape: f32[1,128], index: 16, kind: input, shape index: {}]   ;;  %s1570_s17 = inlined_call_operand.vmem [shape: f32[8,128], index: 17, kind: output, shape index: {0}]   ;;  %s1571_s18 = inlined_call_operand.hbm [shape: f32[8,128], index: 18, kind: output, shape index: {1}]   ;;  %s1572_s19 = inlined_call_operand.hbm [shape: f32[8,128], index: 19, kind: output, shape index: {2}]   ;;  %s1573_s20 = inlined_call_operand.hbm [shape: f32[8,128], index: 20, kind: output, shape index: {3}]   ;;  %s1574_s21 = inlined_call_operand.hbm [shape: f32[8,128], index: 21, kind: output, shape index: {4}]  }
   0x1   :  { %1575 = sst [smem:[#allocation12_spill]] %s1553_s0 }
   0x2   :  { %1576 = sst [smem:[#allocation13_spill]] %s1554_s1 }
   0x3   :  { %1577 = sst [smem:[#allocation14_spill]] %s1555_s2 }
   0x4   :  { %1578 = sst [smem:[#allocation15_spill]] %s1556_s3 }
   0x5   :  { %1579 = sst [smem:[#allocation16_spill]] %s1557_s4 }
   0x6   :  { %1580 = sst [smem:[#allocation17_spill]] %s1558_s5 }
   0x7   :  { %27 = vsyncpa [#allocation3], 0 }
   0x8   :  { %28 = vsyncpa [#allocation5], 0  ;;  %v134_v0 = vld [vmem:[%s1563_s10] sm:$0xff]  ;;  %v135_v1 = vld [vmem:[%s1563_s10 + $0x8] sm:$0xff]  ;;  %v1083_v3 = vmov 0.0|0.0   ;;  %vm1084_vm0 = vmmov 0  }
   0x9   :  { %v118_v2 = vld [vmem:[%s1562_s9] sm:$0xff]  ;;  %874 = vmatprep.subr.bf16.mxu0 %v1083_v3  ;;  %v875_v4 = vpack.c.bf16 %v135_v1, %v134_v0  ;;  %898 = vmatprep.subr.bf16.mxu1 %v1083_v3  ;;  %v119_v5 = vld [vmem:[%s1562_s9 + $0x8] sm:$0xff]  ;;  %v136_v6 = vld [vmem:[%s1563_s10 + $0x10] sm:$0xff]  ;;  %v1085_v11 = vmov 0.0   ;;  %s1581_s29 = sld [smem:[#allocation13_spill]]  ;;  %s1582_s30 = sld [smem:[#allocation17_spill]] }
   0xa   :  { %v137_v7 = vld [vmem:[%s1563_s10 + $0x18] sm:$0xff]  ;;  %v899_v8 = vpack.c.bf16 %v119_v5, %v118_v2  ;;  %v120_v9 = vld [vmem:[%s1562_s9 + $0x10] sm:$0xff]  ;;  %747 = vmatprep.mubr.msk.f32.mxu0 %vm1084_vm0, %v1085_v11  ;;  %782 = vmatprep.mubr.msk.f32.mxu1 %vm1084_vm0, %v1085_v11  ;;  %v138_v14 = vld [vmem:[%s1563_s10 + $0x20] sm:$0xff]  ;;  %s1583_s24 = sld [smem:[#allocation12_spill]]  ;;  %s1584_s3 = sld [smem:[#allocation15_spill]] }
   0xb   :  { %v121_v10 = vld [vmem:[%s1562_s9 + $0x18] sm:$0xff]  ;;  %876 = vmatpush3.bf16.msra.mxu0 %v875_v4  ;;  %v878_v12 = vpack.c.bf16 %v137_v7, %v136_v6  ;;  %v139_v15 = vld [vmem:[%s1563_s10 + $0x28] sm:$0xff]  ;;  %v122_v16 = vld [vmem:[%s1562_s9 + $0x20] sm:$0xff] }
   0xc   :  { %900 = vmatpush3.bf16.msra.mxu1 %v899_v8  ;;  %877 = vmatprep.subr.bf16.mxu0 %v1083_v3  ;;  %v902_v13 = vpack.c.bf16 %v121_v10, %v120_v9  ;;  %v123_v17 = vld [vmem:[%s1562_s9 + $0x28] sm:$0xff]  ;;  %v881_v18 = vpack.c.bf16 %v139_v15, %v138_v14  ;;  %v140_v20 = vld [vmem:[%s1563_s10 + $0x30] sm:$0xff]  ;;  %v141_v21 = vld [vmem:[%s1563_s10 + $0x38] sm:$0xff] }
   0xd   :  { %901 = vmatprep.subr.bf16.mxu1 %v1083_v3  ;;  %v905_v19 = vpack.c.bf16 %v123_v17, %v122_v16  ;;  %v124_v22 = vld [vmem:[%s1562_s9 + $0x30] sm:$0xff]  ;;  %v125_v23 = vld [vmem:[%s1562_s9 + $0x38] sm:$0xff]  ;;  %v142_v24 = vld [vmem:[%s1563_s10 + $0x40] sm:$0xff]  ;;  %v884_v26 = vpack.c.bf16 %v141_v21, %v140_v20 }
   0xe   :  { %v631_v28 = vld [vmem:[%s1559_s6] ss:$0 sm:$0xff]  ;;  %v908_v30 = vpack.c.bf16 %v125_v23, %v124_v22  ;;  %v143_v31 = vld [vmem:[%s1563_s10 + $0x48] sm:$0xff]  ;;  %s1585_s6 = sld [smem:[#allocation16_spill]]  ;;  %v144_v42 = vld [vmem:[%s1563_s10 + $0x50] sm:$0xff] }
   0xf   :  { %879 = vmatpush3.bf16.msra.mxu0 %v878_v12  ;;  %v81_v25 = vld [vmem:[%s1581_s29] sm:$0xff]  ;;  %v127_v36 = vld [vmem:[%s1562_s9 + $0x48] sm:$0xff]  ;;  %v887_v39 = vpack.c.bf16 %v143_v31, %v142_v24  ;;  %v145_v43 = vld [vmem:[%s1563_s10 + $0x58] sm:$0xff]  ;;  %s1586_s29 = sld [smem:[#allocation14_spill]] }
  0x10   :  { %903 = vmatpush3.bf16.msra.mxu1 %v902_v13  ;;  %880 = vmatprep.subr.bf16.mxu0 %v1083_v3  ;;  %v630_v27 = vld [vmem:[%s1582_s30] ss:$0 sm:$0xff]  ;;  %v128_v44 = vld [vmem:[%s1562_s9 + $0x50] sm:$0xff]  ;;  %v129_v45 = vld [vmem:[%s1562_s9 + $0x58] sm:$0xff]  ;;  %v890_v49 = vpack.c.bf16 %v145_v43, %v144_v42 }
  0x11   :  { %904 = vmatprep.subr.bf16.mxu1 %v1083_v3  ;;  %v64_v29 = vld [vmem:[%s1583_s24] sm:$0xff]  ;;  %v89_v32 = vmul.f32 %v630_v27, %v81_v25 }
  0x12   :  { %v628_v33 = vld [vmem:[%s1584_s3] ss:$0 sm:$0xff] }
  0x13   :  { %882 = vmatpush3.bf16.msra.mxu0 %v881_v18  ;;  %v126_v35 = vld [vmem:[%s1562_s9 + $0x40] sm:$0xff]  ;;  %v72_v37 = vmul.f32 %v628_v33, %v64_v29  ;;  %v97_v38 = vadd.f32 %v631_v28, %v89_v32 }
  0x14   :  { %906 = vmatpush3.bf16.msra.mxu1 %v905_v19  ;;  %883 = vmatprep.subr.bf16.mxu0 %v1083_v3  ;;  %v629_v34 = vld [vmem:[%s1585_s6] ss:$0 sm:$0xff]  ;;  %v911_v41 = vpack.c.bf16 %v127_v36, %v126_v35 }
  0x15   :  { %907 = vmatprep.subr.bf16.mxu1 %v1083_v3  ;;  %v80_v40 = vadd.f32 %v629_v34, %v72_v37  ;;  %116 = vst [vmem:[#allocation6] sm:$0xff] %v97_v38  ;;  %v98_v46 = vld [vmem:[%s1586_s29] sm:$0xff] }
  0x16   :  { %v632_v47 = vld [vmem:[%s1560_s7] ss:$0 sm:$0xff] }
  0x17   :  { %885 = vmatpush3.bf16.msra.mxu0 %v884_v26  ;;  %115 = vst [vmem:[#allocation4] sm:$0xff] %v80_v40  ;;  %v633_v48 = vld [vmem:[%s1561_s8] ss:$0 sm:$0xff]  ;;  %v106_v50 = vmul.f32 %v632_v47, %v98_v46 }
  0x18   :  { %909 = vmatpush3.bf16.msra.mxu1 %v908_v30  ;;  %886 = vmatprep.subr.bf16.mxu0 %v1083_v3 }
  0x19   :  { %910 = vmatprep.subr.bf16.mxu1 %v1083_v3 }
  0x1b   :  { %888 = vmatpush3.bf16.msra.mxu0 %v887_v39 }
  0x1c   :  { %29 = vsyncpa [#allocation8], 0  ;;  %912 = vmatpush3.bf16.msra.mxu1 %v911_v41  ;;  %889 = vmatprep.subr.bf16.mxu0 %v1083_v3  ;;  %v914_v51 = vpack.c.bf16 %v129_v45, %v128_v44  ;;  %v146_v52 = vld [vmem:[%s1563_s10 + $0x60] sm:$0xff]  ;;  %v147_v53 = vld [vmem:[%s1563_s10 + $0x68] sm:$0xff]  ;;  %v1327_v56 = vadd.f32 %v633_v48, %v106_v50  ;;  %vm494_vm1 = vcmask 523264   ;;  %s1087_s30 = smov [#allocation2]  }
  0x1d   :  { %913 = vmatprep.subr.bf16.mxu1 %v1083_v3  ;;  %v130_v54 = vld [vmem:[%s1562_s9 + $0x60] sm:$0xff]  ;;  %v131_v55 = vld [vmem:[%s1562_s9 + $0x68] sm:$0xff]  ;;  %v893_v57 = vpack.c.bf16 %v147_v53, %v146_v52  ;;  %v148_v59 = vld [vmem:[%s1563_s10 + $0x70] sm:$0xff] }
  0x1e   :  { %117 = vst [vmem:[#allocation7] sm:$0xff] %v1327_v56  ;;  %v917_v58 = vpack.c.bf16 %v131_v55, %v130_v54  ;;  %v149_v60 = vld [vmem:[%s1563_s10 + $0x78] sm:$0xff]  ;;  %v132_v61 = vld [vmem:[%s1562_s9 + $0x70] sm:$0xff]  ;;  %v290_v1 = vld [vmem:[%s1564_s11] sm:$0xff]  ;;  %s577_s10 = sshll.u32 %s1087_s30, 4  ;;  %s578_s10 = int_to_ptr.vmem [resolvable:$true] %s577_s10 }
  0x1f   :  { %891 = vmatpush3.bf16.msra.mxu0 %v890_v49  ;;  %v133_v62 = vld [vmem:[%s1562_s9 + $0x78] sm:$0xff]  ;;  %v896_v63 = vpack.c.bf16 %v149_v60, %v148_v59  ;;  %v291_v2 = vld [vmem:[%s1564_s11 + $0x8] sm:$0xff]  ;;  %v292_v5 = vld [vmem:[%s1564_s11 + $0x10] sm:$0xff] }
  0x20   :  { %915 = vmatpush3.bf16.msra.mxu1 %v914_v51  ;;  %892 = vmatprep.subr.bf16.mxu0 %v1083_v3  ;;  %v920_v0 = vpack.c.bf16 %v133_v62, %v132_v61  ;;  %v923_v4 = vpack.c.bf16 %v291_v2, %v290_v1  ;;  %v293_v6 = vld [vmem:[%s1564_s11 + $0x18] sm:$0xff]  ;;  %v294_v8 = vld [vmem:[%s1564_s11 + $0x20] sm:$0xff]  ;;  %v295_v9 = vld [vmem:[%s1564_s11 + $0x28] sm:$0xff] }
  0x21   :  { %916 = vmatprep.subr.bf16.mxu1 %v1083_v3  ;;  %v926_v7 = vpack.c.bf16 %v293_v6, %v292_v5  ;;  %v929_v10 = vpack.c.bf16 %v295_v9, %v294_v8  ;;  %v296_v12 = vld [vmem:[%s1564_s11 + $0x30] sm:$0xff]  ;;  %v297_v13 = vld [vmem:[%s1564_s11 + $0x38] sm:$0xff]  ;;  %v298_v15 = vld [vmem:[%s1564_s11 + $0x40] sm:$0xff] }
  0x22   :  { %v932_v14 = vpack.c.bf16 %v297_v13, %v296_v12  ;;  %v299_v16 = vld [vmem:[%s1564_s11 + $0x48] sm:$0xff]  ;;  %v300_v18 = vld [vmem:[%s1564_s11 + $0x50] sm:$0xff]  ;;  %v301_v19 = vld [vmem:[%s1564_s11 + $0x58] sm:$0xff] }
  0x23   :  { %894 = vmatpush3.bf16.msra.mxu0 %v893_v57  ;;  %v935_v17 = vpack.c.bf16 %v299_v16, %v298_v15  ;;  %v938_v20 = vpack.c.bf16 %v301_v19, %v300_v18  ;;  %v302_v21 = vld [vmem:[%s1564_s11 + $0x60] sm:$0xff]  ;;  %v303_v22 = vld [vmem:[%s1564_s11 + $0x68] sm:$0xff]  ;;  %v304_v24 = vld [vmem:[%s1564_s11 + $0x70] sm:$0xff] }
  0x24   :  { %918 = vmatpush3.bf16.msra.mxu1 %v917_v58  ;;  %895 = vmatprep.subr.bf16.mxu0 %v1083_v3  ;;  %v941_v23 = vpack.c.bf16 %v303_v22, %v302_v21  ;;  %v305_v25 = vld [vmem:[%s1564_s11 + $0x78] sm:$0xff]  ;;  %v386_v27 = vld [vmem:[%s1566_s13] sm:$0xff]  ;;  %v387_v28 = vld [vmem:[%s1566_s13 + $0x8] sm:$0xff] }
  0x25   :  { %919 = vmatprep.subr.bf16.mxu1 %v1083_v3  ;;  %v944_v26 = vpack.c.bf16 %v305_v25, %v304_v24  ;;  %v388_v29 = vld [vmem:[%s1566_s13 + $0x10] sm:$0xff]  ;;  %v947_v30 = vpack.c.bf16 %v387_v28, %v386_v27  ;;  %v389_v31 = vld [vmem:[%s1566_s13 + $0x18] sm:$0xff]  ;;  %v391_v33 = vld [vmem:[%s1566_s13 + $0x28] sm:$0xff] }
  0x26   :  { %v950_v32 = vpack.c.bf16 %v389_v31, %v388_v29  ;;  %v392_v35 = vld [vmem:[%s1566_s13 + $0x30] sm:$0xff]  ;;  %v393_v36 = vld [vmem:[%s1566_s13 + $0x38] sm:$0xff]  ;;  %v395_v39 = vld [vmem:[%s1566_s13 + $0x48] sm:$0xff] }
  0x27   :  { %897 = vmatpush3.bf16.msra.mxu0 %v896_v63  ;;  %v956_v37 = vpack.c.bf16 %v393_v36, %v392_v35  ;;  %v396_v41 = vld [vmem:[%s1566_s13 + $0x50] sm:$0xff]  ;;  %v397_v42 = vld [vmem:[%s1566_s13 + $0x58] sm:$0xff]  ;;  %v398_v44 = vld [vmem:[%s1566_s13 + $0x60] sm:$0xff] }
  0x28   :  { %921 = vmatpush3.bf16.msra.mxu1 %v920_v0  ;;  %922 = vmatprep.subr.bf16.mxu0 %v1083_v3  ;;  %v962_v43 = vpack.c.bf16 %v397_v42, %v396_v41  ;;  %v399_v45 = vld [vmem:[%s1566_s13 + $0x68] sm:$0xff]  ;;  %v400_v47 = vld [vmem:[%s1566_s13 + $0x70] sm:$0xff]  ;;  %v401_v48 = vld [vmem:[%s1566_s13 + $0x78] sm:$0xff] }
  0x29   :  { %946 = vmatprep.subr.bf16.mxu1 %v1083_v3  ;;  %v965_v46 = vpack.c.bf16 %v399_v45, %v398_v44  ;;  %v968_v49 = vpack.c.bf16 %v401_v48, %v400_v47  ;;  %v479_v50 = vld [vmem:[%s1568_s15] sm:$0xff]  ;;  %v480_v51 = vld [vmem:[%s1568_s15 + $0x8] sm:$0xff]  ;;  %v481_v52 = vld [vmem:[%s1568_s15 + $0x10] sm:$0xff] }
  0x2a   :  { %748 = vmatmul.mubr.f32.vlgmr.msra.gmra.mrb[0].mxu0 %v97_v38  ;;  %v394_v38 = vld [vmem:[%s1566_s13 + $0x40] sm:$0xff]  ;;  %v971_v53 = vpack.c.bf16 %v480_v51, %v479_v50  ;;  %v482_v54 = vld [vmem:[%s1568_s15 + $0x18] sm:$0xff]  ;;  %v484_v57 = vld [vmem:[%s1568_s15 + $0x28] sm:$0xff] }
  0x2b   :  { %783 = vmatmul.mubr.f32.vlgmr.msra.gmra.mrb[0].mxu1 %v80_v40  ;;  %924 = vmatpush3.bf16.msra.mxu0 %v923_v4  ;;  %v959_v40 = vpack.c.bf16 %v395_v39, %v394_v38  ;;  %v974_v55 = vpack.c.bf16 %v482_v54, %v481_v52  ;;  %v634_v1 = vld [vmem:[%s1565_s12] ss:$0 sm:$0xff]  ;;  %v485_v6 = vld [vmem:[%s1568_s15 + $0x30] sm:$0xff]  ;;  %s1086_s12 = smov [#allocation4]  }
  0x2c   :  { %925 = vmatprep.subr.bf16.mxu0 %v1083_v3  ;;  %817 = vmatprep.mubr.msk.f32.mxu0 %vm1084_vm0, %v1085_v11  ;;  %v635_v8 = vld [vmem:[%s1567_s14] ss:$0 sm:$0xff]  ;;  %s587_s4 = sshll.u32 %s1086_s12, 4  ;;  %s588_s4 = int_to_ptr.vmem [resolvable:$true] %s587_s4 }
  0x2d   :  { %852 = vmatprep.mubr.msk.f32.mxu1 %vm1084_vm0, %v1085_v11  ;;  %948 = vmatpush3.bf16.msra.mxu1 %v947_v30  ;;  %s989_s5 = scalar_lea.vmem %s588_s4, 128  ;;  %p994_p1 = scmp.lt.s32.totalorder %s588_s4, %s588_s4 }
  0x2e   :  { %949 = vmatprep.subr.bf16.mxu1 %v1083_v3  ;;  %p990_p0 = scmp.ne.s32.totalorder %s588_s4, %s989_s5  ;;  %p995_p2 = scmp.lt.s32.totalorder %s989_s5, %s989_s5 }
  0x2f   :  { %927 = vmatpush3.bf16.msra.mxu0 %v926_v7 }
  0x30   :  { %928 = vmatprep.subr.bf16.mxu0 %v1083_v3  ;;  %p996_p3 = por %p995_p2, %p994_p1 }
  0x31   :  { %951 = vmatpush3.bf16.msra.mxu1 %v950_v32 }
  0x32   :  { %952 = vmatprep.subr.bf16.mxu1 %v1083_v3  ;;  %p997_p4 = pnand %p996_p3, %p990_p0 }
  0x33   :  { %930 = vmatpush3.bf16.msra.mxu0 %v929_v10 }
  0x34   :  { %931 = vmatprep.subr.bf16.mxu0 %v1083_v3 }
  0x37   :  { %933 = vmatpush3.bf16.msra.mxu0 %v932_v14 }
  0x38   :  { %934 = vmatprep.subr.bf16.mxu0 %v1083_v3 }
  0x3b   :  { %936 = vmatpush3.bf16.msra.mxu0 %v935_v17 }
  0x3c   :  { %937 = vmatprep.subr.bf16.mxu0 %v1083_v3 }
  0x3f   :  { %939 = vmatpush3.bf16.msra.mxu0 %v938_v20 }
  0x40   :  { %940 = vmatprep.subr.bf16.mxu0 %v1083_v3 }
  0x43   :  { %942 = vmatpush3.bf16.msra.mxu0 %v941_v23 }
  0x44   :  { %943 = vmatprep.subr.bf16.mxu0 %v1083_v3 }
  0x47   :  { %945 = vmatpush3.bf16.msra.mxu0 %v944_v26 }
  0x48   :  { %970 = vmatprep.subr.bf16.mxu0 %v1083_v3 }
  0x4a   :  { %818 = vmatmul.mubr.f32.vlgmr.msra.gmra.mrb[2].mxu0 %v1327_v56  ;;  %v483_v56 = vld [vmem:[%s1568_s15 + $0x20] sm:$0xff] }
  0x4b   :  { %871 = vmatprep.mubr.msk.f32.mxu0 %vm1084_vm0, %v1085_v11  ;;  %v390_v11 = vld [vmem:[%s1566_s13 + $0x20] sm:$0xff]  ;;  %972 = vmatpush3.bf16.msra.mxu0 %v971_v53  ;;  %v977_v58 = vpack.c.bf16 %v484_v57, %v483_v56 }
  0x4c   :  { %v953_v34 = vpack.c.bf16 %v391_v33, %v390_v11  ;;  %973 = vmatprep.subr.bf16.mxu0 %v1083_v3 }
  0x4e   :  { %954 = vmatpush3.bf16.msra.mxu1 %v953_v34 }
  0x4f   :  { %955 = vmatprep.subr.bf16.mxu1 %v1083_v3  ;;  %975 = vmatpush3.bf16.msra.mxu0 %v974_v55 }
  0x50   :  { %976 = vmatprep.subr.bf16.mxu0 %v1083_v3 }
  0x52   :  { %957 = vmatpush3.bf16.msra.mxu1 %v956_v37 }
  0x53   :  { %958 = vmatprep.subr.bf16.mxu1 %v1083_v3  ;;  %978 = vmatpush3.bf16.msra.mxu0 %v977_v58 }
  0x54   :  { %979 = vmatprep.subr.bf16.mxu0 %v1083_v3 }
  0x56   :  { %960 = vmatpush3.bf16.msra.mxu1 %v959_v40 }
  0x57   :  { %961 = vmatprep.subr.bf16.mxu1 %v1083_v3 }
  0x5a   :  { %963 = vmatpush3.bf16.msra.mxu1 %v962_v43 }
  0x5b   :  { %964 = vmatprep.subr.bf16.mxu1 %v1083_v3 }
  0x5e   :  { %966 = vmatpush3.bf16.msra.mxu1 %v965_v46 }
  0x5f   :  { %967 = vmatprep.subr.bf16.mxu1 %v1083_v3  ;;  %v486_v3 = vld [vmem:[%s1568_s15 + $0x38] sm:$0xff] }
  0x60   :  { %v980_v7 = vpack.c.bf16 %v486_v3, %v485_v6 }
  0x62   :  { %969 = vmatpush3.bf16.msra.mxu1 %v968_v49  ;;  %981 = vmatpush3.bf16.msra.mxu0 %v980_v7 }
  0xfd   :  { %v216_v59 = vpop.f32.mrb[0].mxu0 }
  0xfe   :  { %v749_v60 = vpop.f32.mrb[1].mxu0  ;;  %v286_v61 = vpop.f32.mrb[0].mxu1 }
  0xff   :  { %v287_v62 = vadd.f32 %v286_v61, %v216_v59  ;;  %v784_v63 = vpop.f32.mrb[1].mxu1 }
 0x11d   :  { %v372_v0 = vpop.f32.mrb[2].mxu0 }
 0x11e   :  { %v376_v2 = vadd.f32 %v372_v0, %v287_v62  ;;  %v819_v4 = vpop.f32.mrb[3].mxu0 }
 0x120   :  { %v384_v5 = vadd.f32 %v634_v1, %v376_v2 }
 0x122   :  { %385 = vst [vmem:[#allocation2] sm:$0xff] %v384_v5  ;;  %853 = vmatmul.mubr.f32.vlgmr.msra.gmra.mrb[2].mxu1 %v384_v5 }
 0x1f5   :  { %v475_v9 = vpop.f32.mrb[2].mxu1 }
 0x1f6   :  { %v476_v10 = vadd.f32 %v635_v8, %v475_v9  ;;  %v854_v12 = vpop.f32.mrb[3].mxu1 }
 0x1f8   :  { %872 = vmatmul.mubr.msk.f32.vlgmr.msra.gmra.mrb[4].mxu0 %vm494_vm1, %v476_v10 }
 0x1f9   :  { %1000 = shalt.err (!%p997_p4)
}
 0x1fa   :  { %s1001_s14 = scalar_lea.hbm %s1572_s19, 128 }
 0x1fb   :  { %p1002_p5 = scmp.ne.s32.totalorder %s1572_s19, %s1001_s14  ;;  %p1005_p6 = scmp.lt.u32.totalorder %s1001_s14, %s1572_s19 }
 0x1fd   :  { %p1007_p7 = pnand %p1005_p6, %p1002_p5 }
 0x1ff   :  { %1010 = shalt.err (!%p1007_p7)
}
 0x200   :  { %590 = dma.vmem_to_hbm [thread:$0]  %s588_s4, 128, %s1572_s19, [#allocation5]  }
 0x201   :  { %s1011_s24 = scalar_lea.vmem %s578_s10, 128  ;;  %p1016_p9 = scmp.lt.s32.totalorder %s578_s10, %s578_s10 }
 0x202   :  { %p1012_p8 = scmp.ne.s32.totalorder %s578_s10, %s1011_s24  ;;  %p1017_p10 = scmp.lt.s32.totalorder %s1011_s24, %s1011_s24 }
 0x204   :  { %p1018_p11 = por %p1017_p10, %p1016_p9 }
 0x206   :  { %p1019_p12 = pnand %p1018_p11, %p1012_p8 }
 0x208   :  { %1022 = shalt.err (!%p1019_p12)
}
 0x209   :  { %s1023_s26 = scalar_lea.hbm %s1571_s18, 128 }
 0x20a   :  { %p1024_p13 = scmp.ne.s32.totalorder %s1571_s18, %s1023_s26  ;;  %p1027_p0 = scmp.lt.u32.totalorder %s1023_s26, %s1571_s18 }
 0x20c   :  { %p1029_p1 = pnand %p1027_p0, %p1024_p13 }
 0x20e   :  { %1032 = shalt.err (!%p1029_p1)
}
 0x20f   :  { %580 = dma.vmem_to_hbm [thread:$0]  %s578_s10, 128, %s1571_s18, [#allocation3]  }
 0x210   :  { %s1088_s6 = smov [#allocation6]   ;;  %s1089_s12 = smov [#allocation7]  }
 0x211   :  { %s597_s0 = sshll.u32 %s1088_s6, 4  ;;  %s607_s4 = sshll.u32 %s1089_s12, 4  ;;  %s598_s0 = int_to_ptr.vmem [resolvable:$true] %s597_s0  ;;  %s608_s4 = int_to_ptr.vmem [resolvable:$true] %s607_s4 }
 0x212   :  { %s1033_s30 = scalar_lea.vmem %s598_s0, 128  ;;  %p1038_p3 = scmp.lt.s32.totalorder %s598_s0, %s598_s0 }
 0x213   :  { %p1034_p2 = scmp.ne.s32.totalorder %s598_s0, %s1033_s30  ;;  %p1039_p4 = scmp.lt.s32.totalorder %s1033_s30, %s1033_s30 }
 0x215   :  { %p1040_p5 = por %p1039_p4, %p1038_p3 }
 0x217   :  { %p1041_p6 = pnand %p1040_p5, %p1034_p2 }
 0x219   :  { %1044 = shalt.err (!%p1041_p6)
}
 0x21a   :  { %s1045_s9 = scalar_lea.hbm %s1573_s20, 128 }
 0x21b   :  { %p1046_p7 = scmp.ne.s32.totalorder %s1573_s20, %s1045_s9  ;;  %p1049_p8 = scmp.lt.u32.totalorder %s1045_s9, %s1573_s20 }
 0x21d   :  { %p1051_p9 = pnand %p1049_p8, %p1046_p7 }
 0x21f   :  { %1054 = shalt.err (!%p1051_p9)
}
 0x220   :  { %600 = dma.vmem_to_hbm [thread:$0]  %s598_s0, 128, %s1573_s20, [#allocation5]  }
 0x221   :  { %s1055_s7 = scalar_lea.vmem %s608_s4, 128  ;;  %p1060_p11 = scmp.lt.s32.totalorder %s608_s4, %s608_s4 }
 0x222   :  { %p1056_p10 = scmp.ne.s32.totalorder %s608_s4, %s1055_s7  ;;  %p1061_p12 = scmp.lt.s32.totalorder %s1055_s7, %s1055_s7 }
 0x224   :  { %p1062_p13 = por %p1061_p12, %p1060_p11 }
 0x226   :  { %p1063_p0 = pnand %p1062_p13, %p1056_p10 }
 0x228   :  { %1066 = shalt.err (!%p1063_p0)
}
 0x229   :  { %s1067_s24 = scalar_lea.hbm %s1574_s21, 128 }
 0x22a   :  { %p1068_p1 = scmp.ne.s32.totalorder %s1574_s21, %s1067_s24  ;;  %p1071_p2 = scmp.lt.u32.totalorder %s1067_s24, %s1574_s21 }
 0x22c   :  { %p1073_p3 = pnand %p1071_p2, %p1068_p1 }
 0x22e   :  { %1076 = shalt.err (!%p1073_p3)
}
 0x22f   :  { %610 = dma.vmem_to_hbm [thread:$0]  %s608_s4, 128, %s1574_s21, [#allocation8]   ;;  %v636_v13 = vld [vmem:[%s1569_s16] ss:$0 sm:$0xff] }
 0x2cb   :  { %v564_v14 = vpop.f32.mrb[4].mxu0 }
 0x2cc   :  { %v565_v15 = vadd.f32 %v636_v13, %v564_v14  ;;  %v873_v16 = vpop.f32.mrb[5].mxu0 }
 0x2ce   :  { %568 = vst [vmem:[%s1570_s17] sm:$0xff] %v565_v15 }
 0x2cf   :  { %1077 = dma.done.wait [#allocation3], 128  }
 0x2d0   :  { %1078 = vsyncadd [#allocation3], 4294967168 }
 0x2d1   :  { %1079 = dma.done.wait [#allocation5], 256  }
 0x2d2   :  { %1080 = vsyncadd [#allocation5], 4294967040 }
 0x2d3   :  { %1081 = dma.done.wait [#allocation8], 128  }
 0x2d4   :  { %1082 = vsyncadd [#allocation8], 4294967168 }
 0x2d5   :  { %625 = vsyncpa [#allocation3], 1 }
 0x2d6   :  { %626 = vsyncpa [#allocation5], 1 }
 0x2d7   :  { %627 = vsyncpa [#allocation8], 1 }

</bundles_post_ra>
